<compile_context>
chip_gen: v6e
topology: v6e:2x2x1
jax: 0.10.0
libtpu: 0.0.40
codegen_flags: <defaults>
</compile_context>

<pallas_src>
import jax
import jax.numpy as jnp
import numpy as np
from jax.experimental import pallas as pl
from jax.experimental.pallas import tpu as pltpu

EPS = 1e-5  # BatchNorm1d default eps


def _round_up(x, m):
    return ((x + m - 1) // m) * m


# ------------------------------ fused stack kernel ------------------------------

def _make_stack_kernel(n_blocks, l_real):
    """grid=(n_blocks,): one ResBlock per step, activation resident in VMEM scratch.
    Real rows are 1..l_real (row 0 / rows >= l_real+1 are zero conv-padding /
    sublane-alignment rows)."""

    def kernel(h0_ref, w_ref, s_ref, t_ref, w1h_ref, p_ref, bias_ref,
               o_ref, act_ref):
        blk = pl.program_id(0)
        l_al, bc = act_ref.shape

        @pl.when(blk == 0)
        def _():
            act_ref[...] = h0_ref[...]          # load the stem output once

        row = jax.lax.broadcasted_iota(jnp.int32, (l_al, 1), 0)
        valid = (row >= 1) & (row <= l_real)
        cdt = w_ref.dtype                        # MXU operand dtype (bf16 or f32)

        def conv(h, idx):
            # fused BN(eval) + ReLU prologue; re-zero padding/alignment rows
            a = jnp.maximum(h * s_ref[idx] + t_ref[idx], 0.0)
            a = jnp.where(valid, a, 0.0)
            # k=3 taps collapsed into one (l_al, 3*bc) @ (3*bc, bc) MXU matmul.
            # Shifted views built in-register; explicit zero rows act as the
            # conv padding, so no halo fixup and no offset stores are needed.
            zrow = jnp.zeros((1, bc), a.dtype)
            a_m1 = jnp.concatenate([zrow, a[:-1, :]], axis=0)   # row r sees a[r-1]
            a_p1 = jnp.concatenate([a[1:, :], zrow], axis=0)    # row r sees a[r+1]
            aa = jnp.concatenate([a_m1, a, a_p1], axis=1).astype(cdt)
            return jnp.dot(aa, w_ref[idx], preferred_element_type=jnp.float32)

        h = act_ref[...]                         # (l_al, bc) f32, pad rows zero
        c1 = conv(h, 0)                          # BN1 + ReLU + conv1
        c2 = conv(c1, 1)                         # BN2 + ReLU + conv2
        hn = jnp.where(valid, c2 + h, 0.0)       # fused residual add + re-zero pads
        act_ref[...] = hn                        # single aligned full-tile store

        @pl.when(blk == n_blocks - 1)
        def _():
            # head: fc1 over length (learned weighted sum) + ReLU + predictor
            z = jnp.sum(hn * w1h_ref[...], axis=0, keepdims=True)       # (1, B*C)
            zr = jnp.maximum(z + bias_ref[0], 0.0)
            o_ref[...] = (jnp.dot(zr, p_ref[...],
                                  preferred_element_type=jnp.float32)
                          + bias_ref[1])                                 # (1, B)

    return kernel


def resnet_stack_head(h0, W, S, T, w1h, P, bias, *, l_real, batch):
    """h0: (l_al, B*C) f32 stem output (padded layout).  Returns (1, B) f32."""
    l_al, bc = h0.shape
    nb = W.shape[0]
    return pl.pallas_call(
        _make_stack_kernel(nb, l_real),
        out_shape=jax.ShapeDtypeStruct((1, batch), jnp.float32),
        grid=(nb,),
        in_specs=[
            pl.BlockSpec((l_al, bc), lambda i: (0, 0)),                   # h0 (loaded once)
            pl.BlockSpec((None, 2, 3 * bc, bc), lambda i: (i, 0, 0, 0)),  # conv weights, streamed
            pl.BlockSpec((None, 2, 1, bc), lambda i: (i, 0, 0, 0)),       # BN scale
            pl.BlockSpec((None, 2, 1, bc), lambda i: (i, 0, 0, 0)),       # BN shift
            pl.BlockSpec((l_al, bc), lambda i: (0, 0)),                   # fc1 weight (lane-dense)
            pl.BlockSpec((bc, batch), lambda i: (0, 0)),                  # predictor block weight
            pl.BlockSpec(memory_space=pltpu.MemorySpace.SMEM),            # [fc1_b, pred_b]
        ],
        out_specs=pl.BlockSpec((1, batch), lambda i: (0, 0)),
        scratch_shapes=[pltpu.VMEM((l_al, bc), jnp.float32)],             # resident activation
        compiler_params=pltpu.CompilerParams(
            dimension_semantics=("arbitrary",)),                          # sequential carry
    )(h0, W, S, T, w1h, P, bias)


# ----------------------- stem (plain JAX, tiny) + batch fold -----------------------

def stem_and_fold(x_ble, stem_w, stem_b, l_al):
    """ConvTranspose1d(E->MP, k=3, stride=2, pad=0), channels-last, then fold the
    batch into the lane axis and add the zero padding rows.
    x_ble: (B, L, E) -> (l_al, B*MP) f32."""
    B, L, E = x_ble.shape
    mp = stem_w.shape[1]
    hp = jax.lax.Precision.HIGHEST
    y = jnp.einsum('ble,eok->blko', x_ble, stem_w, precision=hp)      # (B, L, 3, MP)
    y0, y1, y2 = y[:, :, 0, :], y[:, :, 1, :], y[:, :, 2, :]
    # output position 2m   <- y0[m] + y2[m-1]   (m = 0..L)
    # output position 2m+1 <- y1[m]             (m = 0..L-1)
    even = (jnp.pad(y0, ((0, 0), (0, 1), (0, 0)))
            + jnp.pad(y2, ((0, 0), (1, 0), (0, 0))))                   # (B, L+1, MP)
    body = jnp.stack([even[:, :L, :], y1], axis=2).reshape(B, 2 * L, mp)
    out = jnp.concatenate([body, even[:, L:, :]], axis=1) + stem_b[None, None, :]
    h = jnp.transpose(out, (1, 0, 2)).reshape(2 * L + 1, B * mp)       # fold batch into lanes
    return jnp.pad(h, ((1, l_al - 2 * L - 2), (0, 0)))                 # padded layout


# --------------------- parameter prep (outside jit, once) ---------------------

def bn_fold(bn):
    s = bn['gamma'] / jnp.sqrt(bn['rv'] + EPS)
    t = bn['beta'] - bn['rm'] * s
    return s, t


def grouped_to_dense(w_oik, groups):
    """(Cout, Cin/groups, 3) grouped Conv1d weight -> dense block-diagonal
    (3, Cin, Cout) so the kernel runs one dense MXU matmul per tap."""
    Cout, Cin_g, K = w_oik.shape
    Cout_g = Cout // groups
    w = jnp.transpose(w_oik, (2, 1, 0)).reshape(K, Cin_g, groups, Cout_g)
    dense = jnp.zeros((K, groups, Cin_g, groups, Cout_g), w_oik.dtype)
    g = jnp.arange(groups)
    dense = dense.at[:, g, :, g, :].set(jnp.transpose(w, (2, 0, 1, 3)))
    return dense.reshape(K, groups * Cin_g, groups * Cout_g)


def prepare_params(params, batch, compute_dtype=jnp.bfloat16, groups=4):
    """BN folding, grouped->dense conv weights, batch fold (kron with I_B),
    tap collapse (3, BC, BC) -> (3*BC, BC), head weight pre-broadcast."""
    cd = compute_dtype
    E, mp, _ = params['stem_w'].shape
    BC = batch * mp
    eye_b = jnp.eye(batch, dtype=jnp.float32)

    W_blocks, S_blocks, T_blocks = [], [], []
    for p in params['blocks']:
        wrow, srow, trow = [], [], []
        for bn, wk in ((p['bn1'], p['conv1_w']), (p['bn2'], p['conv2_w'])):
            s, t = bn_fold(bn)
            srow.append(jnp.tile(s, batch).reshape(1, BC))
            trow.append(jnp.tile(t, batch).reshape(1, BC))
            wd = grouped_to_dense(wk, groups)                          # (3, MP, MP)
            wf = jnp.concatenate([jnp.kron(eye_b, wd[k]) for k in range(3)],
                                 axis=0)                               # (3*BC, BC)
            wrow.append(wf)
        W_blocks.append(jnp.stack(wrow))                               # (2, 3*BC, BC)
        S_blocks.append(jnp.stack(srow))                               # (2, 1, BC)
        T_blocks.append(jnp.stack(trow))

    l_real = params['fc1_w'].shape[1]            # 2*seq_len + 1 (stride_down == 1)
    l_al = _round_up(l_real + 2, 16)             # + conv pad rows, sublane aligned
    w1 = jnp.pad(params['fc1_w'][0], (1, l_al - l_real - 1))

    return dict(
        stem_w=params['stem_w'], stem_b=params['stem_b'],
        W=jnp.stack(W_blocks).astype(cd),                     # (NB, 2, 3*BC, BC)
        S=jnp.stack(S_blocks),                                # (NB, 2, 1, BC) f32
        T=jnp.stack(T_blocks),                                # (NB, 2, 1, BC) f32
        w1h=jnp.tile(w1.reshape(-1, 1), (1, BC)),             # (l_al, BC) lane-dense fc1 weight
        P=jnp.kron(eye_b, params['pred_w'].reshape(mp, 1)),   # (BC, B) block predictor weight
        bias=jnp.concatenate([params['fc1_b'],
                              params['pred_b']]).astype(jnp.float32),   # (2,) SMEM scalars
    )


# ----------------------------------- forward -----------------------------------

def forward(x_ble, prep, mask=None):
    """Pallas forward.  x_ble: (B, L, embedding_dim) -> (B, 1)."""
    if mask is not None:                          # x.masked_fill(mask, 0)
        x_ble = jnp.where(mask[:, :, None], 0.0, x_ble)
    B, L, _ = x_ble.shape
    l_al = prep['w1h'].shape[0]
    h0 = stem_and_fold(x_ble, prep['stem_w'], prep['stem_b'], l_al)
    out = resnet_stack_head(h0, prep['W'], prep['S'], prep['T'],
                            prep['w1h'], prep['P'], prep['bias'],
                            l_real=2 * L + 1, batch=B)        # (1, B)
    return out.reshape(B, 1)


# --------------------------- deterministic parameters ---------------------------

def init_params(key, emb_dim, mp, seq_len, groups=4):
    keys = iter(jax.random.split(key, 128))

    def nrm(shape, scale=0.1):
        return (scale * jax.random.normal(next(keys), shape)).astype(jnp.float32)

    def bn_params(c):
        return dict(gamma=1.0 + nrm((c,), 0.05), beta=nrm((c,), 0.05),
                    rm=nrm((c,), 0.1), rv=0.5 + jnp.abs(nrm((c,), 0.2)))

    params = dict(stem_w=nrm((emb_dim, mp, 3)),   # ConvTranspose1d weight (in, out, k)
                  stem_b=nrm((mp,)))
    params['blocks'] = [
        dict(bn1=bn_params(mp), conv1_w=nrm((mp, mp // groups, 3)),
             bn2=bn_params(mp), conv2_w=nrm((mp, mp // groups, 3)))
        for _ in range(6)]
    params['fc1_w'] = nrm((1, 2 * seq_len + 1))   # stride_down == 1 head
    params['fc1_b'] = nrm((1,))
    params['pred_w'] = nrm((1, mp))
    params['pred_b'] = nrm((1,))
    return params


# ------------------ pure-JAX reference (NCL, mirrors PyTorch) ------------------

def _ref_bn(x_ncl, bn):
    s = bn['gamma'] / jnp.sqrt(bn['rv'] + EPS)
    t = bn['beta'] - bn['rm'] * s
    return x_ncl * s[None, :, None] + t[None, :, None]


def _ref_conv1d(x_ncl, w, groups, stride=1, pad=1):
    return jax.lax.conv_general_dilated(
        x_ncl, w, window_strides=(stride,), padding=((pad, pad),),
        dimension_numbers=('NCH', 'OIH', 'NCH'), feature_group_count=groups,
        precision=jax.lax.Precision.HIGHEST)


def _ref_conv_transpose1d(x_ncl, w_iok, b, stride=2):
    K = w_iok.shape[2]
    w_oik = jnp.transpose(jnp.flip(w_iok, axis=2), (1, 0, 2))
    out = jax.lax.conv_general_dilated(
        x_ncl, w_oik, window_strides=(1,), padding=((K - 1, K - 1),),
        lhs_dilation=(stride,), dimension_numbers=('NCH', 'OIH', 'NCH'),
        precision=jax.lax.Precision.HIGHEST)
    return out + b[None, :, None]


def _ref_resblock(x, p, groups):
    h = jax.nn.relu(_ref_bn(x, p['bn1']))
    h = _ref_conv1d(h, p['conv1_w'], groups)
    h = jax.nn.relu(_ref_bn(h, p['bn2']))
    h = _ref_conv1d(h, p['conv2_w'], groups)
    return h + x                                  # stride=1, equal planes


def ref_forward(x_ble, params, groups=4):
    x = jnp.transpose(x_ble, (0, 2, 1))                                   # (B, E, L)
    x = _ref_conv_transpose1d(x, params['stem_w'], params['stem_b'])      # (B, MP, 2L+1)
    for p in params['blocks']:
        x = _ref_resblock(x, p, groups)
    B, C, Lc = x.shape
    z = jnp.dot(x.reshape(B * C, Lc), params['fc1_w'].T,
                precision=jax.lax.Precision.HIGHEST) + params['fc1_b']
    z = jax.nn.relu(z).reshape(B, C)
    return jnp.dot(z, params['pred_w'].T,
                   precision=jax.lax.Precision.HIGHEST) + params['pred_b']


# ----------------------------------- main -----------------------------------

if __name__ == "__main__":
    B, L, EMB, MP, GROUPS = 2, 16, 32, 64, 4     # small shapes consistent with the module
    key = jax.random.PRNGKey(0)
    kx, kp = jax.random.split(key)
    x = jax.random.normal(kx, (B, L, EMB), dtype=jnp.float32)
    params = init_params(kp, EMB, MP, seq_len=L, groups=GROUPS)

    ref = ref_forward(x, params, GROUPS)
    fwd = jax.jit(forward)

    # f32 MXU operands: correctness anchor (tighter tolerance than before)
    out_f32 = jax.block_until_ready(fwd(x, prepare_params(params, B, jnp.float32, GROUPS)))
    assert out_f32.shape == (B, 1)
    np.testing.assert_allclose(np.asarray(out_f32), np.asarray(ref), rtol=5e-3, atol=5e-3)

    # bf16 MXU operands (f32 accumulation / f32 elementwise): fast path
    out_bf16 = jax.block_until_ready(fwd(x, prepare_params(params, B, jnp.bfloat16, GROUPS)))
    np.testing.assert_allclose(np.asarray(out_bf16), np.asarray(ref), rtol=5e-2, atol=5e-2)

    print("KERNEL_OK")
</pallas_src>

<mosaic_0001>
module attributes {stable_mosaic.version = 11 : i64} {
  func.func @kernel(%arg0: i32, %arg1: memref<48x128xf32, #tpu.memory_space<vmem>>, %arg2: memref<1x2x384x128xf32, #tpu.memory_space<vmem>>, %arg3: memref<1x2x1x128xf32, #tpu.memory_space<vmem>>, %arg4: memref<1x2x1x128xf32, #tpu.memory_space<vmem>>, %arg5: memref<48x128xf32, #tpu.memory_space<vmem>>, %arg6: memref<128x2xf32, #tpu.memory_space<vmem>>, %arg7: memref<2xf32, #tpu.memory_space<smem>>, %arg8: memref<1x2xf32, #tpu.memory_space<vmem>>, %arg9: memref<48x128xf32, #tpu.memory_space<vmem>>) attributes {dimension_semantics = [#tpu.dimension_semantics<arbitrary>], iteration_bounds = array<i64: 6>, scalar_prefetch = 0 : i64, scratch_operands = 1 : i64, tpu.core_type = #tpu.core_type<tc>, window_params = [{pipeline_mode = #tpu.pipeline_mode<synchronous>, transform_indices = @transform_0, window_bounds = array<i64: 48, 128>}, {transform_indices = @transform_1, window_bounds = array<i64: 1, 2, 384, 128>}, {transform_indices = @transform_2, window_bounds = array<i64: 1, 2, 1, 128>}, {transform_indices = @transform_3, window_bounds = array<i64: 1, 2, 1, 128>}, {pipeline_mode = #tpu.pipeline_mode<synchronous>, transform_indices = @transform_4, window_bounds = array<i64: 48, 128>}, {pipeline_mode = #tpu.pipeline_mode<synchronous>, transform_indices = @transform_5, window_bounds = array<i64: 128, 2>}, {transform_indices = @transform_6, window_bounds = array<i64: 2>}, {pipeline_mode = #tpu.pipeline_mode<synchronous>, transform_indices = @transform_7, window_bounds = array<i64: 1, 2>}]} {
    %c0_i32 = arith.constant 0 : i32
    %0 = arith.cmpi eq, %arg0, %c0_i32 : i32
    %1 = arith.extui %0 : i1 to i32
    %c0_i32_0 = arith.constant 0 : i32
    %2 = arith.cmpi ne, %1, %c0_i32_0 : i32
    scf.if %2 {
      %c0_36 = arith.constant 0 : index
      %c0_37 = arith.constant 0 : index
      %65 = vector.load %arg1[%c0_36, %c0_37] : memref<48x128xf32, #tpu.memory_space<vmem>>, vector<48x128xf32>
      %c0_38 = arith.constant 0 : index
      %c0_39 = arith.constant 0 : index
      %66 = vector.load %arg9[%c0_38, %c0_39] : memref<48x128xf32, #tpu.memory_space<vmem>>, vector<48x128xf32>
      tpu.vector_store %arg9[%c0_38, %c0_39], %65 {strides = array<i32>} : memref<48x128xf32, #tpu.memory_space<vmem>>, vector<48x128xf32>,
    } else {
    }
    %3 = tpu.iota {dimensions = array<i32: 0>} : vector<48x1xi32>
    %c1_i32 = arith.constant 1 : i32
    %4 = vector.broadcast %c1_i32 : i32 to vector<48x1xi32>
    %5 = arith.cmpi sge, %3, %4 : vector<48x1xi32>
    %c33_i32 = arith.constant 33 : i32
    %6 = vector.broadcast %c33_i32 : i32 to vector<48x1xi32>
    %7 = arith.cmpi sle, %3, %6 : vector<48x1xi32>
    %8 = arith.andi %5, %7 : vector<48x1xi1>
    %c0 = arith.constant 0 : index
    %c0_1 = arith.constant 0 : index
    %9 = vector.load %arg9[%c0, %c0_1] : memref<48x128xf32, #tpu.memory_space<vmem>>, vector<48x128xf32>
    %c0_2 = arith.constant 0 : index
    %c0_3 = arith.constant 0 : index
    %c0_4 = arith.constant 0 : index
    %c0_5 = arith.constant 0 : index
    %10 = vector.load %arg3[%c0_2, %c0_3, %c0_4, %c0_5] : memref<1x2x1x128xf32, #tpu.memory_space<vmem>>, vector<1x1x1x128xf32>
    %11 = vector.shape_cast %10 : vector<1x1x1x128xf32> to vector<1x128xf32>
    %12 = vector.broadcast %11 : vector<1x128xf32> to vector<48x128xf32>
    %13 = arith.mulf %9, %12 : vector<48x128xf32>
    %c0_6 = arith.constant 0 : index
    %c0_7 = arith.constant 0 : index
    %c0_8 = arith.constant 0 : index
    %c0_9 = arith.constant 0 : index
    %14 = vector.load %arg4[%c0_6, %c0_7, %c0_8, %c0_9] : memref<1x2x1x128xf32, #tpu.memory_space<vmem>>, vector<1x1x1x128xf32>
    %15 = vector.shape_cast %14 : vector<1x1x1x128xf32> to vector<1x128xf32>
    %16 = vector.broadcast %15 : vector<1x128xf32> to vector<48x128xf32>
    %17 = arith.addf %13, %16 : vector<48x128xf32>
    %cst = arith.constant 0.000000e+00 : f32
    %18 = vector.broadcast %cst : f32 to vector<48x128xf32>
    %19 = arith.maximumf %17, %18 : vector<48x128xf32>
    %cst_10 = arith.constant 0.000000e+00 : f32
    %20 = vector.shape_cast %8 : vector<48x1xi1> to vector<48x1xi1>
    %21 = vector.broadcast %20 : vector<48x1xi1> to vector<48x128xi1>
    %22 = vector.broadcast %cst_10 : f32 to vector<48x128xf32>
    %23 = arith.select %21, %19, %22 : vector<48x128xi1>, vector<48x128xf32>
    %cst_11 = arith.constant 0.000000e+00 : f32
    %24 = vector.broadcast %cst_11 : f32 to vector<1x128xf32>
    %25 = vector.extract_strided_slice %23 {offsets = [0, 0], sizes = [47, 128], strides = [1, 1]} : vector<48x128xf32> to vector<47x128xf32>
    %26 = tpu.concatenate %24, %25 in 0 : vector<1x128xf32>, vector<47x128xf32> -> vector<48x128xf32>
    %27 = vector.extract_strided_slice %23 {offsets = [1, 0], sizes = [47, 128], strides = [1, 1]} : vector<48x128xf32> to vector<47x128xf32>
    %28 = tpu.concatenate %27, %24 in 0 : vector<47x128xf32>, vector<1x128xf32> -> vector<48x128xf32>
    %29 = tpu.concatenate %26, %23, %28 in 1 : vector<48x128xf32>, vector<48x128xf32>, vector<48x128xf32> -> vector<48x384xf32>
    %c0_12 = arith.constant 0 : index
    %c0_13 = arith.constant 0 : index
    %c0_14 = arith.constant 0 : index
    %c0_15 = arith.constant 0 : index
    %30 = vector.load %arg2[%c0_12, %c0_13, %c0_14, %c0_15] : memref<1x2x384x128xf32, #tpu.memory_space<vmem>>, vector<1x1x384x128xf32>
    %31 = vector.shape_cast %30 : vector<1x1x384x128xf32> to vector<384x128xf32>
    %cst_16 = arith.constant dense<0.000000e+00> : vector<48x128xf32>
    %32 = tpu.matmul %29, %31, %cst_16 {dimension_numbers = #tpu.dot_dimension_numbers<[1], [0], [0], [1], [0, 0, 1, 1], [], []>} : vector<48x384xf32>, vector<384x128xf32>, vector<48x128xf32> -> vector<48x128xf32>
    %c0_17 = arith.constant 0 : index
    %c1 = arith.constant 1 : index
    %c0_18 = arith.constant 0 : index
    %c0_19 = arith.constant 0 : index
    %33 = vector.load %arg3[%c0_17, %c1, %c0_18, %c0_19] : memref<1x2x1x128xf32, #tpu.memory_space<vmem>>, vector<1x1x1x128xf32>
    %34 = vector.shape_cast %33 : vector<1x1x1x128xf32> to vector<1x128xf32>
    %35 = vector.broadcast %34 : vector<1x128xf32> to vector<48x128xf32>
    %36 = arith.mulf %32, %35 : vector<48x128xf32>
    %c0_20 = arith.constant 0 : index
    %c1_21 = arith.constant 1 : index
    %c0_22 = arith.constant 0 : index
    %c0_23 = arith.constant 0 : index
    %37 = vector.load %arg4[%c0_20, %c1_21, %c0_22, %c0_23] : memref<1x2x1x128xf32, #tpu.memory_space<vmem>>, vector<1x1x1x128xf32>
    %38 = vector.shape_cast %37 : vector<1x1x1x128xf32> to vector<1x128xf32>
    %39 = vector.broadcast %38 : vector<1x128xf32> to vector<48x128xf32>
    %40 = arith.addf %36, %39 : vector<48x128xf32>
    %cst_24 = arith.constant 0.000000e+00 : f32
    %41 = vector.broadcast %cst_24 : f32 to vector<48x128xf32>
    %42 = arith.maximumf %40, %41 : vector<48x128xf32>
    %cst_25 = arith.constant 0.000000e+00 : f32
    %43 = vector.shape_cast %8 : vector<48x1xi1> to vector<48x1xi1>
    %44 = vector.broadcast %43 : vector<48x1xi1> to vector<48x128xi1>
    %45 = vector.broadcast %cst_25 : f32 to vector<48x128xf32>
    %46 = arith.select %44, %42, %45 : vector<48x128xi1>, vector<48x128xf32>
    %cst_26 = arith.constant 0.000000e+00 : f32
    %47 = vector.broadcast %cst_26 : f32 to vector<1x128xf32>
    %48 = vector.extract_strided_slice %46 {offsets = [0, 0], sizes = [47, 128], strides = [1, 1]} : vector<48x128xf32> to vector<47x128xf32>
    %49 = tpu.concatenate %47, %48 in 0 : vector<1x128xf32>, vector<47x128xf32> -> vector<48x128xf32>
    %50 = vector.extract_strided_slice %46 {offsets = [1, 0], sizes = [47, 128], strides = [1, 1]} : vector<48x128xf32> to vector<47x128xf32>
    %51 = tpu.concatenate %50, %47 in 0 : vector<47x128xf32>, vector<1x128xf32> -> vector<48x128xf32>
    %52 = tpu.concatenate %49, %46, %51 in 1 : vector<48x128xf32>, vector<48x128xf32>, vector<48x128xf32> -> vector<48x384xf32>
    %c0_27 = arith.constant 0 : index
    %c1_28 = arith.constant 1 : index
    %c0_29 = arith.constant 0 : index
    %c0_30 = arith.constant 0 : index
    %53 = vector.load %arg2[%c0_27, %c1_28, %c0_29, %c0_30] : memref<1x2x384x128xf32, #tpu.memory_space<vmem>>, vector<1x1x384x128xf32>
    %54 = vector.shape_cast %53 : vector<1x1x384x128xf32> to vector<384x128xf32>
    %cst_31 = arith.constant dense<0.000000e+00> : vector<48x128xf32>
    %55 = tpu.matmul %52, %54, %cst_31 {dimension_numbers = #tpu.dot_dimension_numbers<[1], [0], [0], [1], [0, 0, 1, 1], [], []>} : vector<48x384xf32>, vector<384x128xf32>, vector<48x128xf32> -> vector<48x128xf32>
    %56 = arith.addf %55, %9 : vector<48x128xf32>
    %cst_32 = arith.constant 0.000000e+00 : f32
    %57 = vector.shape_cast %8 : vector<48x1xi1> to vector<48x1xi1>
    %58 = vector.broadcast %57 : vector<48x1xi1> to vector<48x128xi1>
    %59 = vector.broadcast %cst_32 : f32 to vector<48x128xf32>
    %60 = arith.select %58, %56, %59 : vector<48x128xi1>, vector<48x128xf32>
    %c0_33 = arith.constant 0 : index
    %c0_34 = arith.constant 0 : index
    %61 = vector.load %arg9[%c0_33, %c0_34] : memref<48x128xf32, #tpu.memory_space<vmem>>, vector<48x128xf32>
    tpu.vector_store %arg9[%c0_33, %c0_34], %60 {strides = array<i32>} : memref<48x128xf32, #tpu.memory_space<vmem>>, vector<48x128xf32>,
    %c5_i32 = arith.constant 5 : i32
    %62 = arith.cmpi eq, %arg0, %c5_i32 : i32
    %63 = arith.extui %62 : i1 to i32
    %c0_i32_35 = arith.constant 0 : i32
    %64 = arith.cmpi ne, %63, %c0_i32_35 : i32
    scf.if %64 {
      %c0_36 = arith.constant 0 : index
      %c0_37 = arith.constant 0 : index
      %65 = vector.load %arg5[%c0_36, %c0_37] : memref<48x128xf32, #tpu.memory_space<vmem>>, vector<48x128xf32>
      %66 = arith.mulf %60, %65 : vector<48x128xf32>
      %cst_38 = arith.constant dense<0.000000e+00> : vector<128xf32>
      %67 = vector.multi_reduction <add>, %66, %cst_38 [0] : vector<48x128xf32> to vector<128xf32>
      %68 = vector.shape_cast %67 : vector<128xf32> to vector<1x128xf32>
      %c0_39 = arith.constant 0 : index
      %69 = memref.load %arg7[%c0_39] : memref<2xf32, #tpu.memory_space<smem>>
      %70 = vector.broadcast %69 : f32 to vector<1x128xf32>
      %71 = arith.addf %68, %70 : vector<1x128xf32>
      %cst_40 = arith.constant 0.000000e+00 : f32
      %72 = vector.broadcast %cst_40 : f32 to vector<1x128xf32>
      %73 = arith.maximumf %71, %72 : vector<1x128xf32>
      %c0_41 = arith.constant 0 : index
      %c0_42 = arith.constant 0 : index
      %74 = vector.load %arg6[%c0_41, %c0_42] : memref<128x2xf32, #tpu.memory_space<vmem>>, vector<128x2xf32>
      %cst_43 = arith.constant dense<0.000000e+00> : vector<1x2xf32>
      %75 = tpu.matmul %73, %74, %cst_43 {dimension_numbers = #tpu.dot_dimension_numbers<[1], [0], [0], [1], [0, 0, 1, 1], [], []>} : vector<1x128xf32>, vector<128x2xf32>, vector<1x2xf32> -> vector<1x2xf32>
      %c1_44 = arith.constant 1 : index
      %76 = memref.load %arg7[%c1_44] : memref<2xf32, #tpu.memory_space<smem>>
      %77 = vector.broadcast %76 : f32 to vector<1x2xf32>
      %78 = arith.addf %75, %77 : vector<1x2xf32>
      %c0_45 = arith.constant 0 : index
      %c0_46 = arith.constant 0 : index
      %79 = vector.load %arg8[%c0_45, %c0_46] : memref<1x2xf32, #tpu.memory_space<vmem>>, vector<1x2xf32>
      tpu.vector_store %arg8[%c0_45, %c0_46], %78 {strides = array<i32>} : memref<1x2xf32, #tpu.memory_space<vmem>>, vector<1x2xf32>,
    } else {
    }
    return
  }
  func.func @transform_0(%arg0: i32) -> (i32, i32) {
    %c0_i32 = arith.constant 0 : i32
    %c0_i32_0 = arith.constant 0 : i32
    %c0_i32_1 = arith.constant 0 : i32
    return %c0_i32, %c0_i32_0 : i32, i32
  }
  func.func @transform_1(%arg0: i32) -> (i32, i32, i32, i32) {
    %c0_i32 = arith.constant 0 : i32
    %c0_i32_0 = arith.constant 0 : i32
    %c0_i32_1 = arith.constant 0 : i32
    %c0_i32_2 = arith.constant 0 : i32
    return %arg0, %c0_i32, %c0_i32_0, %c0_i32_1 : i32, i32, i32, i32
  }
  func.func @transform_2(%arg0: i32) -> (i32, i32, i32, i32) {
    %c0_i32 = arith.constant 0 : i32
    %c0_i32_0 = arith.constant 0 : i32
    %c0_i32_1 = arith.constant 0 : i32
    %c0_i32_2 = arith.constant 0 : i32
    return %arg0, %c0_i32, %c0_i32_0, %c0_i32_1 : i32, i32, i32, i32
  }
  func.func @transform_3(%arg0: i32) -> (i32, i32, i32, i32) {
    %c0_i32 = arith.constant 0 : i32
    %c0_i32_0 = arith.constant 0 : i32
    %c0_i32_1 = arith.constant 0 : i32
    %c0_i32_2 = arith.constant 0 : i32
    return %arg0, %c0_i32, %c0_i32_0, %c0_i32_1 : i32, i32, i32, i32
  }
  func.func @transform_4(%arg0: i32) -> (i32, i32) {
    %c0_i32 = arith.constant 0 : i32
    %c0_i32_0 = arith.constant 0 : i32
    %c0_i32_1 = arith.constant 0 : i32
    return %c0_i32, %c0_i32_0 : i32, i32
  }
  func.func @transform_5(%arg0: i32) -> (i32, i32) {
    %c0_i32 = arith.constant 0 : i32
    %c0_i32_0 = arith.constant 0 : i32
    %c0_i32_1 = arith.constant 0 : i32
    return %c0_i32, %c0_i32_0 : i32, i32
  }
  func.func @transform_6(%arg0: i32) -> i32 {
    %c0_i32 = arith.constant 0 : i32
    %c0_i32_0 = arith.constant 0 : i32
    return %c0_i32 : i32
  }
  func.func @transform_7(%arg0: i32) -> (i32, i32) {
    %c0_i32 = arith.constant 0 : i32
    %c0_i32_0 = arith.constant 0 : i32
    %c0_i32_1 = arith.constant 0 : i32
    return %c0_i32, %c0_i32_0 : i32, i32
  }
}

</mosaic_0001>

<bundles_post_ra>
// kernel: forward.1
= control target key start
LH: loop header
LB: loop body
LE: loop exit
PB: predicated region body
PF: predicated region fallthrough
CT: control target
= control target key end

     0   :  { %s2604_s0 = inlined_call_operand.vmem [shape: f32[48,128], index: 0, kind: input, shape index: {}]   ;;  %s2605_s1 = inlined_call_operand.hbm [shape: f32[6,2,384,128], index: 1, kind: input, shape index: {}]   ;;  %s2606_s2 = inlined_call_operand.hbm [shape: f32[6,2,1,128], index: 2, kind: input, shape index: {}]   ;;  %s2607_s3 = inlined_call_operand.hbm [shape: f32[6,2,1,128], index: 3, kind: input, shape index: {}]   ;;  %s2608_s4 = inlined_call_operand.hbm [shape: f32[48,128], index: 4, kind: input, shape index: {}]   ;;  %s2609_s5 = inlined_call_operand.vmem [shape: f32[128,2], index: 5, kind: input, shape index: {}]   ;;  %s2610_s6 = inlined_call_operand.hbm [shape: f32[2], index: 6, kind: input, shape index: {}]   ;;  %s2611_s7 = inlined_call_operand.hbm [shape: f32[1,2], index: 7, kind: output, shape index: {}]  }
   0x1   :  { %2621 = sst [smem:[#allocation22_spill]] %s2606_s2 }
   0x2   :  { %2622 = sst [smem:[#allocation23_spill]] %s2609_s5 }
   0x3   :  { %2623 = sst [smem:[#allocation24_spill]] %s2611_s7 }
   0x4   :  { %12 = vsyncpa [#allocation4], 0 }
   0x5   :  { %14 = vsyncpa [#allocation4 + $0x1], 0 }
   0x6   :  { %15 = vsyncpa [#allocation8], 0 }
   0x7   :  { %17 = vsyncpa [#allocation8 + $0x1], 0 }
   0x8   :  { %18 = vsyncpa [#allocation11], 0 }
   0x9   :  { %19 = vsyncpa [#allocation6], 0 }
   0xa   :  { %20 = vsyncpa [#allocation5], 0  ;;  %s2049_s24 = smov 0   ;;  %s2051_s25 = smov 0  }
   0xb   :  { %s2053_s26 = smov 0   ;;  %s2055_s27 = smov 0  }
   0xc LB: > { %2624 = sst [smem:[#allocation19_spill]] %s1990_s26  ;;  %s2070_s28 = sadd.s32 1, %s1994_s27   ;;  %s1994_s27 = sphi %s2055_s27, %s2646_s27   ;;  %s1990_s26 = sphi %s2053_s26, %s2648_s26   ;;  %s1986_s25 = sphi %s2051_s25, %s2650_s25   ;;  %s1982_s24 = sphi %s2049_s24, %s2649_s24  }
   0xd   : > { %2625 = sst [smem:[#allocation20_spill]] %s2070_s28  ;;  %s54_s29 = sadd.s32 1, %s1990_s26 }
   0xe   : > { %s51_s30 = ssub.s32 %s1994_s27, %s2070_s28  ;;  %p61_p0 = scmp.ne.s32.totalorder %s1990_s26, %s1986_s25 }
   0xf   : > { %p52_p1 = scmp.eq.s32.totalorder %s51_s30, 0  ;;  %p62_p2 = scmp.eq.s32.totalorder %s1994_s27, 0 }
  0x10   : > { %p1752_p3 = scmp.lt.s32.totalorder %s1994_s27, 6  ;;  %s2083_s9 = sand.u32 1, %s1990_s26  }
  0x11   : > { %s2080_s8 = scalar_select %p52_p1, %s1990_s26, %s54_s29  }
  0x12   : > { %p63_p4 = por %p62_p2, %p61_p0  ;;  %s276_s10 = sand.u32 1, %s1994_s27  }
  0x13   : > { %2626 = sst [smem:[#allocation21_spill]] %s2080_s8  ;;  %s1350_s11 = sshll.u32 %s2083_s9, 1 }
  0x14   : > { %p2087_p5 = pnand %p1752_p3, %p63_p4  ;;  %s1432_s13 = sshll.u32 %s1994_s27, 5 }
  0x15   : > { %s2628_s2 = sld [smem:[#allocation22_spill]]  ;;  %s280_s17 = scalar_lea.vmem [#allocation7], %s1350_s11 }
  0x16   : > { %s287_s18 = sshll.u32 %s280_s17, 4  ;;  %s2103_s19 = scalar_lea.sflag [#allocation8], %s276_s10  ;;  %s2101_s18 = int_to_ptr.vmem [resolvable:$true] %s287_s18 }
  0x17   : > { %p2109_p7 = pneg %p2087_p5 }
  0x1b   : > { %s2097_s16 = scalar_lea.hbm %s2628_s2, %s1432_s13  ;;  %s1804_s29 = scalar_lea.hbm %s2628_s2, 192 }
  0x1c   : > { %s1799_s20 = scalar_lea.hbm %s2097_s16, 32  ;;  %p1805_p10 = scmp.lt.s32.totalorder %s2097_s16, %s2628_s2 }
  0x1d   : > { %p1800_p6 = scmp.ne.s32.totalorder %s2097_s16, %s1799_s20  ;;  %p1806_p11 = scmp.lt.s32.totalorder %s1804_s29, %s1799_s20 }
  0x1f   : > { %p1802_p8 = pnand %p2109_p7, %p1800_p6  ;;  %p1807_p12 = por %p1806_p11, %p1805_p10 }
  0x21   : > { %p1803_p9 = pneg %p1802_p8 }
  0x23   : > { %p1808_p13 = pnand %p1807_p12, %p1803_p9 }
  0x25   : > { %1811 = shalt.err (!%p1808_p13)
}
  0x26   : > { %s1812_s10 = scalar_lea.vmem %s2101_s18, 32  ;;  %s1996_s15 = smov [#allocation7]  }
  0x27   : > { %p1813_p0 = scmp.ne.s32.totalorder %s2101_s18, %s1812_s10  ;;  %s1817_s17 = sshll.u32 %s1996_s15, 4  ;;  %s1818_s17 = int_to_ptr.vmem [resolvable:$false] %s1817_s17 }
  0x28   : > { %s1819_s22 = scalar_lea.vmem %s1818_s17, 64  ;;  %p1820_p3 = scmp.lt.s32.totalorder %s2101_s18, %s1818_s17 }
  0x29   : > { %p1815_p1 = pnand %p1813_p0, %p2109_p7  ;;  %p1821_p4 = scmp.lt.s32.totalorder %s1819_s22, %s1812_s10 }
  0x2b   : > { %p1816_p2 = pneg %p1815_p1  ;;  %p1822_p6 = por %p1821_p4, %p1820_p3 }
  0x2d   : > { %p1823_p8 = pnand %p1822_p6, %p1816_p2 }
  0x2f   : > { %1826 = shalt.err (!%p1823_p8)
}
  0x30   : > { %s2613_s20 = smov 16   ;;  %s2614_s23 = smov 1  }
  0x31   : > { %1746 = dma.hbm_to_vmem [thread:$0]  (!%p2087_p5), %s2097_s16, 32, %s2101_s18, %s2103_s19, %s2613_s20, %s2613_s20, %s2614_s23  }
  0x32   : > { %s2140_s14 = scalar_lea.hbm %s2607_s3, %s1432_s13  ;;  %s301_s10 = scalar_lea.vmem [#allocation9], %s1350_s11 }
  0x33   : > { %s308_s15 = sshll.u32 %s301_s10, 4  ;;  %s2145_s17 = sadd.s32 4294967295, %s1994_s27   ;;  %s2163_s15 = int_to_ptr.vmem [resolvable:$true] %s308_s15 }
  0x34   : > { %p67_p9 = scmp.ne.s32.totalorder %s1986_s25, %s1982_s24  ;;  %p2619_p10 = scmp.eq.s32.totalorder %s2145_s17, 0 }
  0x35   : > { %p1345_p11 = scmp.ge.s32.totalorder %s1994_s27, 1  ;;  %p214_p12 = scmp.lt.s32.totalorder %s1994_s27, 7 }
  0x36   : > { %p2155_p0 = por %p2619_p10, %p67_p9  ;;  %s1999_s16 = smov [#allocation10]  }
  0x37   : > { %p2159_p1 = pnand %p1345_p11, %p214_p12  ;;  %s229_s18 = sshll.u32 %s1999_s16, 4  ;;  %s230_s18 = int_to_ptr.vmem [resolvable:$true] %s229_s18 }
  0x38   : > { %s2630_s13 = scalar_select %p2155_p0, 1, 0 }
  0x39   : > { %s2631_s11 = scalar_select %p2159_p1, 1, 0 }
  0x3a   : > { %p1733_p2 = pneg %p2159_p1  ;;  %s1712_s22 = smul.u32 768, %s2083_s9 }
  0x3b   : > { %s1713_s29 = smul.u32 12288, %s1994_s27  ;;  %s1838_s30 = scalar_lea.vmem %s230_s18, 768 }
  0x3c   : > { %p2169_p3 = pnand %p1733_p2, %p2619_p10  ;;  %p1839_p6 = scmp.ne.s32.totalorder %s230_s18, %s1838_s30 }
  0x3d   : > { %p1846_p11 = scmp.lt.s32.totalorder %s230_s18, %s230_s18  ;;  %p1847_p12 = scmp.lt.s32.totalorder %s1838_s30, %s1838_s30 }
  0x3e   : > { %p1829_p4 = pneg %p2169_p3 }
  0x3f   : > { %p1848_p13 = por %p1847_p12, %p1846_p11 }
  0x40   : > { %p1841_p8 = pnand %p1839_p6, %p1829_p4 }
  0x42   : > { %p1842_p9 = pneg %p1841_p8 }
  0x44   : > { %p1849_p0 = pnand %p1848_p13, %p1842_p9 }
  0x46   : > { %1852 = shalt.err (!%p1849_p0)
}
  0x47   : > { %s2000_s10 = smov 128   ;;  %s2001_s16 = smov 8  }
  0x48   : > { %1736 = dma.hbm_to_vmem [thread:$0]  (!%p2169_p3), %s2608_s4, 768, %s230_s18, [#allocation11], %s2000_s10, %s2000_s10, %s2001_s16  }
  0x49   : > { %s2002_s23 = smov [#allocation12]   ;;  %s2193_s28 = scalar_lea.hbm %s2605_s1, %s1713_s29 }
  0x4a   : > { %1739 = dma.hbm_to_smem (!%p2169_p3), %s2610_s6, 16, %s2002_s23, [#allocation6]  }
  0x4b   : > { %s259_s7 = scalar_lea.vmem [#allocation3], %s1712_s22  ;;  %s256_s20 = scalar_lea.sflag [#allocation4], %s2083_s9 }
  0x4c   : > { %s266_s5 = sshll.u32 %s259_s7, 4  ;;  %s1864_s18 = scalar_lea.hbm %s2193_s28, 12288  ;;  %s2195_s5 = int_to_ptr.vmem [resolvable:$true] %s266_s5 }
  0x4d   : > { %p1865_p13 = scmp.ne.s32.totalorder %s2193_s28, %s1864_s18  ;;  %s1869_s24 = scalar_lea.hbm %s2605_s1, 73728 }
  0x4e   : > { %p1870_p3 = scmp.lt.s32.totalorder %s2193_s28, %s2605_s1  ;;  %p1871_p4 = scmp.lt.s32.totalorder %s1869_s24, %s1864_s18 }
  0x4f   : > { %p1867_p0 = pnand %p1865_p13, %p2109_p7 }
  0x50   : > { %p1872_p6 = por %p1871_p4, %p1870_p3 }
  0x51   : > { %p1868_p2 = pneg %p1867_p0 }
  0x53   : > { %p1873_p8 = pnand %p1872_p6, %p1868_p2 }
  0x55   : > { %1876 = shalt.err (!%p1873_p8)
}
  0x56   : > { %s1877_s7 = scalar_lea.vmem %s2195_s5, 12288  ;;  %s2003_s9 = smov [#allocation3]  }
  0x57   : > { %p1878_p9 = scmp.ne.s32.totalorder %s2195_s5, %s1877_s7  ;;  %s1882_s22 = sshll.u32 %s2003_s9, 4  ;;  %s1883_s22 = int_to_ptr.vmem [resolvable:$false] %s1882_s22 }
  0x58   : > { %s1884_s29 = scalar_lea.vmem %s1883_s22, 24576  ;;  %p1885_p13 = scmp.lt.s32.totalorder %s2195_s5, %s1883_s22 }
  0x59   : > { %p1880_p11 = pnand %p1878_p9, %p2109_p7  ;;  %p1886_p0 = scmp.lt.s32.totalorder %s1884_s29, %s1877_s7 }
  0x5b   : > { %p1881_p12 = pneg %p1880_p11  ;;  %p1887_p10 = por %p1886_p0, %p1885_p13 }
  0x5d   : > { %p1888_p1 = pnand %p1887_p10, %p1881_p12 }
  0x5f   : > { %1891 = shalt.err (!%p1888_p1)
}
  0x60   : > { %1743 = dma.hbm_to_vmem [thread:$0]  (!%p2087_p5), %s2193_s28, 12288, %s2195_s5, %s256_s20, %s2000_s10, %s2000_s10, %s2001_s16  }
  0x61   : > { %s1892_s27 = scalar_lea.hbm %s2140_s14, 32  ;;  %s1897_s2 = scalar_lea.hbm %s2607_s3, 192 }
  0x62   : > { %p1893_p2 = scmp.ne.s32.totalorder %s2140_s14, %s1892_s27  ;;  %p1898_p10 = scmp.lt.s32.totalorder %s2140_s14, %s2607_s3 }
  0x63   : > { %p1899_p1 = scmp.lt.s32.totalorder %s1897_s2, %s1892_s27 }
  0x64   : > { %p1895_p3 = pnand %p1893_p2, %p2109_p7 }
  0x65   : > { %p1900_p6 = por %p1899_p1, %p1898_p10 }
  0x66   : > { %p1896_p4 = pneg %p1895_p3 }
  0x68   : > { %p1901_p8 = pnand %p1900_p6, %p1896_p4 }
  0x6a   : > { %1904 = shalt.err (!%p1901_p8)
}
  0x6b   : > { %s1905_s5 = scalar_lea.vmem %s2163_s15, 32  ;;  %s2004_s28 = smov [#allocation9]  }
  0x6c   : > { %p1906_p9 = scmp.ne.s32.totalorder %s2163_s15, %s1905_s5  ;;  %s1910_s10 = sshll.u32 %s2004_s28, 4  ;;  %s1911_s10 = int_to_ptr.vmem [resolvable:$false] %s1910_s10 }
  0x6d   : > { %s1912_s16 = scalar_lea.vmem %s1911_s10, 64  ;;  %p1913_p13 = scmp.lt.s32.totalorder %s2163_s15, %s1911_s10 }
  0x6e   : > { %p1908_p11 = pnand %p1906_p9, %p2109_p7  ;;  %p1914_p0 = scmp.lt.s32.totalorder %s1912_s16, %s1905_s5 }
  0x70   : > { %p1909_p12 = pneg %p1908_p11  ;;  %p1915_p2 = por %p1914_p0, %p1913_p13 }
  0x72   : > { %p1916_p3 = pnand %p1915_p2, %p1909_p12 }
  0x74   : > { %1919 = shalt.err (!%p1916_p3)
}
  0x75   : > { %s2633_s20 = smov 1   ;;  %s2634_s26 = smov 16  }
  0x76   : > { %1749 = dma.hbm_to_vmem [thread:$0]  (!%p2087_p5), %s2140_s14, 32, %s2163_s15, %s2103_s19, %s2634_s26, %s2634_s26, %s2633_s20  }
  0x77   : > { %p2635_p7 = scmp.ne.s32.totalorder %s2631_s11, 0 }
  0x78   : > { %s322_s21 = sand.u32 (!%p2635_p7), 1, %s1986_s25   ;;  %p2636_p4 = scmp.ne.s32.totalorder (!%p2635_p7), %s2630_s13, 0 }
  0x79   : > { %320 = sbr.rel (%p2635_p7) target bundleno = 862 (0x35e), region = 48  ;;  %s323_s7 = scalar_lea.sflag (!%p2635_p7), [#allocation4], %s322_s21 }
  0x7a   : > { %s1714_s8 = smul.u32 (!%p2635_p7), 768, %s322_s21 }
  0x7c   : > { %s2248_s9 = scalar_lea.vmem (!%p2635_p7), [#allocation3], %s1714_s8 }
  0x7e   : > { %1961 = dma.done.wait (%p2636_p4), %s323_s7, 12288  }
  0x7f   : > { %1963 = vsyncadd (%p2636_p4), %s323_s7, 4294955008  ;;  %s331_s12 = sand.u32 1, %s2145_s17   ;;  %s1357_s22 = sshll.u32 %s322_s21, 1 }
  0x80   : > { %s332_s19 = scalar_lea.sflag [#allocation8], %s331_s12  ;;  %s2255_s14 = scalar_lea.vmem [#allocation7], %s1357_s22 }
  0x81   : > { %1965 = dma.done.wait (%p2636_p4), %s332_s19, 64  }
  0x82   : > { %1967 = vsyncadd (%p2636_p4), %s332_s19, 4294967232  ;;  %s2261_s15 = scalar_lea.vmem [#allocation9], %s1357_s22  ;;  %p2637_p5 = scmp.eq.s32.totalorder %s2145_s17, 0 }
  0x84   : > { %1969 = dma.done.wait (%p2637_p5), [#allocation11], 768   ;;  %p2638_p10 = pmov %p2637_p5 }
  0x85   : > { %p2639_p1 = pmov %p2637_p5 }
  0x86   : > { %1971 = vsyncadd (%p2638_p10), [#allocation11], 4294966528 }
  0x87   : > { %1973 = dma.done.wait (%p2639_p1), [#allocation6], 16   ;;  %p2640_p6 = pmov %p2639_p1 }
  0x89   : > { %1975 = vsyncadd (%p2640_p6), [#allocation6], 4294967280 }
  0x8a   : > { %357 = sfence }
  0x8b   : > { %p2641_p8 = scmp.ne.s32.totalorder %s2145_s17, 0 }
  0x8d   : > { %392 = sbr.rel (%p2641_p8) target bundleno = 150 (0x96), region = 72 }
  0x92   : > { %v393_v0 = vld [vmem:[%s2604_s0] sm:$0xff]  ;;  %v394_v1 = vld [vmem:[%s2604_s0 + $0x8] sm:$0xff]  ;;  %v395_v2 = vld [vmem:[%s2604_s0 + $0x10] sm:$0xff] }
  0x93   : > { %399 = vst [vmem:[#allocation2 + $0x28] sm:$0xff] %v393_v0  ;;  %400 = vst [vmem:[#allocation2 + $0x10] sm:$0xff] %v394_v1  ;;  %v396_v3 = vld [vmem:[%s2604_s0 + $0x18] sm:$0xff]  ;;  %v397_v4 = vld [vmem:[%s2604_s0 + $0x20] sm:$0xff] }
  0x94   : > { %401 = vst [vmem:[#allocation2 + $0x8] sm:$0xff] %v395_v2  ;;  %402 = vst [vmem:[#allocation2] sm:$0xff] %v396_v3 }
  0x95   : > { %403 = vst [vmem:[#allocation2 + $0x18] sm:$0xff] %v397_v4 }
  0x96 PF: > { %v561_v5 = vld [vmem:[%s2248_s9 + $0xf8] sm:$0xff]  ;;  %v560_v8 = vld [vmem:[%s2248_s9 + $0xf0] sm:$0xff]  ;;  %v559_v11 = vld [vmem:[%s2248_s9 + $0xe8] sm:$0xff]  ;;  %v405_v29 = vlaneseq  ;;  %vm492_vm2 = vcmask 1040384   ;;  %vm511_vm3 = vcmask 1046528   ;;  %p1426_p9 = scmp.ne.s32.totalorder %s2145_s17, 5 }
  0x97   : > { %v545_v6 = vld [vmem:[%s2248_s9 + $0x78] sm:$0xff]  ;;  %1434 = vmatprep.subr.mxu0 %v561_v5  ;;  %v544_v9 = vld [vmem:[%s2248_s9 + $0x70] sm:$0xff]  ;;  %v575_v12 = vld [vmem:[%s2248_s9 + $0x168] sm:$0xff]  ;;  %s2644_s16 = sld [smem:[#allocation23_spill]] (!%p1426_p9) }
  0x98   : > { %v577_v7 = vld [vmem:[%s2248_s9 + $0x178] sm:$0xff]  ;;  %v576_v10 = vld [vmem:[%s2248_s9 + $0x170] sm:$0xff]  ;;  %1435 = vmatpush3.msra.mxu0 %v545_v6  ;;  %v543_v13 = vld [vmem:[%s2248_s9 + $0x68] sm:$0xff]  ;;  %v2323_v40 = vshrl.u32 %v405_v29, 7  ;;  %s1128_s5 = sld [smem:[#allocation12]] (!%p1426_p9) }
  0x99   : > { %1595 = vmatprep.subr.mxu1 %v577_v7  ;;  %1436 = vmatprep.subr.mxu0 %v560_v8  ;;  %v558_v14 = vld [vmem:[%s2248_s9 + $0xe0] sm:$0xff]  ;;  %v557_v17 = vld [vmem:[%s2248_s9 + $0xd8] sm:$0xff]  ;;  %v556_v20 = vld [vmem:[%s2248_s9 + $0xd0] sm:$0xff]  ;;  %s1427_s19 = sld [smem:[#allocation12 + $0x1]] (!%p1426_p9) }
  0x9a   : > { %1596 = vmatpush3.msra.mxu1 %v577_v7  ;;  %1437 = vmatpush3.msra.mxu0 %v544_v9  ;;  %v574_v15 = vld [vmem:[%s2248_s9 + $0x160] sm:$0xff]  ;;  %v573_v18 = vld [vmem:[%s2248_s9 + $0x158] sm:$0xff]  ;;  %v572_v21 = vld [vmem:[%s2248_s9 + $0x150] sm:$0xff]  ;;  %vm412_vm0 = vcmp.ge.s32.totalorder %v2323_v40, 1  ;;  %v2352_v63 = vadd.s32 32, %v2323_v40 }
  0x9b   : > { %1597 = vmatprep.subr.mxu1 %v576_v10  ;;  %1438 = vmatprep.subr.mxu0 %v559_v11  ;;  %v542_v16 = vld [vmem:[%s2248_s9 + $0x60] sm:$0xff]  ;;  %v541_v19 = vld [vmem:[%s2248_s9 + $0x58] sm:$0xff]  ;;  %v540_v22 = vld [vmem:[%s2248_s9 + $0x50] sm:$0xff] }
  0x9c   : > { %1598 = vmatpush3.msra.mxu1 %v576_v10  ;;  %1439 = vmatpush3.msra.mxu0 %v543_v13  ;;  %v555_v23 = vld [vmem:[%s2248_s9 + $0xc8] sm:$0xff]  ;;  %v554_v26 = vld [vmem:[%s2248_s9 + $0xc0] sm:$0xff]  ;;  %v553_v30 = vld [vmem:[%s2248_s9 + $0xb8] sm:$0xff]  ;;  %vm422_vm1 = vcmp.le.s32.totalorder %v2352_v63, 33 }
  0x9d   : > { %1599 = vmatprep.subr.mxu1 %v575_v12  ;;  %1440 = vmatprep.subr.mxu0 %v558_v14  ;;  %v571_v24 = vld [vmem:[%s2248_s9 + $0x148] sm:$0xff]  ;;  %v570_v27 = vld [vmem:[%s2248_s9 + $0x140] sm:$0xff]  ;;  %v537_v31 = vld [vmem:[%s2248_s9 + $0x38] sm:$0xff] }
  0x9e   : > { %1600 = vmatpush3.msra.mxu1 %v575_v12  ;;  %1441 = vmatpush3.msra.mxu0 %v542_v16  ;;  %v539_v25 = vld [vmem:[%s2248_s9 + $0x48] sm:$0xff]  ;;  %v538_v28 = vld [vmem:[%s2248_s9 + $0x40] sm:$0xff]  ;;  %v569_v32 = vld [vmem:[%s2248_s9 + $0x138] sm:$0xff] }
  0x9f   : > { %1601 = vmatprep.subr.mxu1 %v574_v15  ;;  %1442 = vmatprep.subr.mxu0 %v557_v17  ;;  %v552_v33 = vld [vmem:[%s2248_s9 + $0xb0] sm:$0xff]  ;;  %v2317_v35 = vld [vmem:[#allocation2 + $0x28] sm:$0xff]  ;;  %v1362_v37 = vld [vmem:[%s2255_s14] ss:$0 sm:$0xff] }
  0xa0   : > { %1602 = vmatpush3.msra.mxu1 %v574_v15  ;;  %1443 = vmatpush3.msra.mxu0 %v541_v19  ;;  %v536_v34 = vld [vmem:[%s2248_s9 + $0x30] sm:$0xff]  ;;  %v1363_v38 = vld [vmem:[%s2261_s15] ss:$0 sm:$0xff]  ;;  %v551_v39 = vld [vmem:[%s2248_s9 + $0xa8] sm:$0xff]  ;;  %v443_v41 = vmul.f32 %v1362_v37, %v2317_v35 }
  0xa1   : > { %1603 = vmatprep.subr.mxu1 %v573_v18  ;;  %1444 = vmatprep.subr.mxu0 %v556_v20  ;;  %v568_v36 = vld [vmem:[%s2248_s9 + $0x130] sm:$0xff]  ;;  %v2326_v42 = vld [vmem:[#allocation2 + $0x10] sm:$0xff]  ;;  %v2328_v43 = vld [vmem:[#allocation2 + $0x8] sm:$0xff] }
  0xa2   : > { %1604 = vmatpush3.msra.mxu1 %v573_v18  ;;  %1445 = vmatpush3.msra.mxu0 %v540_v22  ;;  %v567_v44 = vld [vmem:[%s2248_s9 + $0x128] sm:$0xff]  ;;  %v444_v45 = vmul.f32 %v1362_v37, %v2326_v42  ;;  %v445_v46 = vmul.f32 %v1362_v37, %v2328_v43  ;;  %v2333_v47 = vld [vmem:[#allocation2] sm:$0xff]  ;;  %v2338_v50 = vadd.f32 %v1363_v38, %v443_v41  ;;  %v550_v53 = vld [vmem:[%s2248_s9 + $0xa0] sm:$0xff] }
  0xa3   : > { %1605 = vmatprep.subr.mxu1 %v572_v21  ;;  %1446 = vmatprep.subr.mxu0 %v555_v23  ;;  %v2335_v48 = vld [vmem:[#allocation2 + $0x18] sm:$0xff]  ;;  %v446_v51 = vmul.f32 %v1362_v37, %v2333_v47  ;;  %v566_v54 = vld [vmem:[%s2248_s9 + $0x120] sm:$0xff]  ;;  %v549_v61 = vld [vmem:[%s2248_s9 + $0x98] sm:$0xff] }
  0xa4   : > { %1606 = vmatpush3.msra.mxu1 %v572_v21  ;;  %1447 = vmatpush3.msra.mxu0 %v539_v25  ;;  %v535_v49 = vld [vmem:[%s2248_s9 + $0x28] sm:$0xff]  ;;  %v447_v52 = vmul.f32 %v1362_v37, %v2335_v48  ;;  %v457_v55 = vadd.f32 %v1363_v38, %v444_v45  ;;  %v458_v56 = vadd.f32 %v1363_v38, %v445_v46  ;;  %v534_v57 = vld [vmem:[%s2248_s9 + $0x20] sm:$0xff]  ;;  %v462_v58 = vmax.f32 %v2338_v50, 0.0  ;;  %v565_v62 = vld [vmem:[%s2248_s9 + $0x118] sm:$0xff] }
  0xa5   : > { %1607 = vmatprep.subr.mxu1 %v571_v24  ;;  %1448 = vmatprep.subr.mxu0 %v554_v26  ;;  %v459_v59 = vadd.f32 %v1363_v38, %v446_v51  ;;  %v533_v0 = vld [vmem:[%s2248_s9 + $0x18] sm:$0xff]  ;;  %v548_v2 = vld [vmem:[%s2248_s9 + $0x90] sm:$0xff]  ;;  %v547_v9 = vld [vmem:[%s2248_s9 + $0x88] sm:$0xff] }
  0xa6   : > { %1608 = vmatpush3.msra.mxu1 %v571_v24  ;;  %1449 = vmatpush3.msra.mxu0 %v538_v28  ;;  %v2347_v60 = vadd.f32 %v1363_v38, %v447_v52  ;;  %v2355_v1 = vmax.f32 %v457_v55, 0.0  ;;  %v564_v3 = vld [vmem:[%s2248_s9 + $0x110] sm:$0xff]  ;;  %v480_v4 = vsel %vm412_vm0, %v462_v58, 0.0  ;;  %v2361_v5 = vmax.f32 %v458_v56, 0.0  ;;  %v563_v10 = vld [vmem:[%s2248_s9 + $0x108] sm:$0xff]  ;;  %v546_v14 = vld [vmem:[%s2248_s9 + $0x80] sm:$0xff] }
  0xa7   : > { %1609 = vmatprep.subr.mxu1 %v570_v27  ;;  %1450 = vmatprep.subr.mxu0 %v553_v30  ;;  %v532_v6 = vld [vmem:[%s2248_s9 + $0x10] sm:$0xff]  ;;  %v2364_v7 = vmax.f32 %v459_v59, 0.0  ;;  %v531_v11 = vld [vmem:[%s2248_s9 + $0x8] sm:$0xff]  ;;  %v512_v12 = vrot.slane %v480_v4, 1  ;;  %v530_v16 = vld [vmem:[%s2248_s9] sm:$0xff]  ;;  %v493_v17 = vrot.slane %v480_v4, 7 }
  0xa8   : > { %1610 = vmatpush3.msra.mxu1 %v570_v27  ;;  %1451 = vmatpush3.msra.mxu0 %v537_v31  ;;  %v466_v8 = vmax.f32 %v2347_v60, 0.0  ;;  %v513_v13 = vrot.slane %v2355_v1, 1  ;;  %v515_v15 = vrot.slane %v2361_v5, 1  ;;  %v562_v18 = vld [vmem:[%s2248_s9 + $0x100] sm:$0xff]  ;;  %vm2384_vm4 = vmneg %vm492_vm2  ;;  %v494_v22 = vrot.slane %v2355_v1, 7  ;;  %v1404_v26 = vld [vmem:[%s2248_s9 + $0x278] sm:$0xff] }
  0xa9   : > { %1611 = vmatprep.subr.mxu1 %v569_v32  ;;  %1452 = vmatprep.subr.mxu0 %v552_v33  ;;  %v517_v19 = vrot.slane %v2364_v7, 1  ;;  %v2005_v28 = vmov 0.0   ;;  %v1388_v30 = vld [vmem:[%s2248_s9 + $0x1f8] sm:$0xff]  ;;  %v1403_v33 = vld [vmem:[%s2248_s9 + $0x270] sm:$0xff]  ;;  %v1402_v37 = vld [vmem:[%s2248_s9 + $0x268] sm:$0xff] }
  0xaa   : > { %1612 = vmatpush3.msra.mxu1 %v569_v32  ;;  %1453 = vmatpush3.msra.mxu0 %v536_v34  ;;  %v2381_v20 = vsel %vm422_vm1, %v466_v8, 0.0  ;;  %v514_v23 = vsel %vm511_vm3, %v512_v12, %v513_v13  ;;  %v516_v24 = vsel %vm511_vm3, %v513_v13, %v515_v15  ;;  %v2399_v29 = vrot.slane %v2005_v28, 1  ;;  %v1387_v34 = vld [vmem:[%s2248_s9 + $0x1f0] sm:$0xff]  ;;  %v1401_v45 = vld [vmem:[%s2248_s9 + $0x260] sm:$0xff]  ;;  %v1420_v50 = vld [vmem:[%s2248_s9 + $0x2f8] sm:$0xff] }
  0xab   : > { %1613 = vmatprep.subr.mxu1 %v568_v36  ;;  %1454 = vmatprep.subr.mxu0 %v551_v39  ;;  %v519_v25 = vrot.slane %v2381_v20, 1  ;;  %v518_v27 = vsel %vm511_vm3, %v515_v15, %v517_v19  ;;  %v495_v31 = vsel %vm492_vm2, %v493_v17, %v494_v22  ;;  %v496_v32 = vrot.slane %v2361_v5, 7  ;;  %v1386_v39 = vld [vmem:[%s2248_s9 + $0x1e8] sm:$0xff]  ;;  %v1385_v46 = vld [vmem:[%s2248_s9 + $0x1e0] sm:$0xff]  ;;  %v1384_v51 = vld [vmem:[%s2248_s9 + $0x1d8] sm:$0xff] }
  0xac   : > { %1614 = vmatpush3.msra.mxu1 %v568_v36  ;;  %1455 = vmatpush3.msra.mxu0 %v535_v49  ;;  %v1400_v49 = vld [vmem:[%s2248_s9 + $0x258] sm:$0xff]  ;;  %v1419_v55 = vld [vmem:[%s2248_s9 + $0x2f0] sm:$0xff]  ;;  %v1418_v59 = vld [vmem:[%s2248_s9 + $0x2e8] sm:$0xff] }
  0xad   : > { %1615 = vmatprep.subr.mxu1 %v567_v44  ;;  %1456 = vmatprep.subr.mxu0 %v550_v53  ;;  %v520_v36 = vsel %vm511_vm3, %v517_v19, %v519_v25  ;;  %v522_v38 = vsel %vm511_vm3, %v519_v25, %v2399_v29  ;;  %v497_v41 = vsel %vm492_vm2, %v494_v22, %v496_v32  ;;  %v500_v53 = vrot.slane %v2381_v20, 7  ;;  %v1383_v56 = vld [vmem:[%s2248_s9 + $0x1d0] sm:$0xff]  ;;  %v1381_v60 = vld [vmem:[%s2248_s9 + $0x1c0] sm:$0xff]  ;;  %v1392_v13 = vld [vmem:[%s2248_s9 + $0x218] sm:$0xff] }
  0xae   : > { %1616 = vmatpush3.msra.mxu1 %v567_v44  ;;  %1457 = vmatpush3.msra.mxu0 %v534_v57  ;;  %v498_v44 = vrot.slane %v2364_v7, 7  ;;  %v1398_v57 = vld [vmem:[%s2248_s9 + $0x248] sm:$0xff]  ;;  %v1395_v4 = vld [vmem:[%s2248_s9 + $0x230] sm:$0xff]  ;;  %v1377_v12 = vld [vmem:[%s2248_s9 + $0x1a0] sm:$0xff] }
  0xaf   : > { %1617 = vmatprep.subr.mxu1 %v566_v54  ;;  %1458 = vmatprep.subr.mxu0 %v549_v61  ;;  %v1382_v61 = vld [vmem:[%s2248_s9 + $0x1c8] sm:$0xff]  ;;  %v1376_v15 = vld [vmem:[%s2248_s9 + $0x198] sm:$0xff]  ;;  %v1375_v22 = vld [vmem:[%s2248_s9 + $0x190] sm:$0xff] }
  0xb0   : > { %1618 = vmatpush3.msra.mxu1 %v566_v54  ;;  %1459 = vmatpush3.msra.mxu0 %v533_v0  ;;  %v499_v52 = vsel %vm492_vm2, %v496_v32, %v498_v44  ;;  %v1399_v54 = vld [vmem:[%s2248_s9 + $0x250] sm:$0xff]  ;;  %v1417_v0 = vld [vmem:[%s2248_s9 + $0x2e0] sm:$0xff]  ;;  %v1374_v25 = vld [vmem:[%s2248_s9 + $0x188] sm:$0xff] }
  0xb1   : > { %1619 = vmatprep.subr.mxu1 %v565_v62  ;;  %1460 = vmatprep.subr.mxu0 %v548_v2  ;;  %v1416_v2 = vld [vmem:[%s2248_s9 + $0x2d8] sm:$0xff]  ;;  %v1373_v20 = vld [vmem:[%s2248_s9 + $0x180] sm:$0xff]  ;;  %v1406_v32 = vld [vmem:[%s2248_s9 + $0x288] sm:$0xff] }
  0xb2   : > { %1620 = vmatpush3.msra.mxu1 %v565_v62  ;;  %1461 = vmatpush3.msra.mxu0 %v532_v6  ;;  %v1397_v62 = vld [vmem:[%s2248_s9 + $0x240] sm:$0xff]  ;;  %v1379_v6 = vld [vmem:[%s2248_s9 + $0x1b0] sm:$0xff] }
  0xb3   : > { %1621 = vmatprep.subr.mxu1 %v564_v3  ;;  %1462 = vmatprep.subr.mxu0 %v547_v9  ;;  %v1378_v9 = vld [vmem:[%s2248_s9 + $0x1a8] sm:$0xff] }
  0xb4   : > { %1622 = vmatpush3.msra.mxu1 %v564_v3  ;;  %1463 = vmatpush3.msra.mxu0 %v531_v11  ;;  %v1380_v3 = vld [vmem:[%s2248_s9 + $0x1b8] sm:$0xff]  ;;  %v1413_v11 = vld [vmem:[%s2248_s9 + $0x2c0] sm:$0xff] }
  0xb5   : > { %1623 = vmatprep.subr.mxu1 %v563_v10  ;;  %1464 = vmatprep.subr.mxu0 %v546_v14  ;;  %v1412_v14 = vld [vmem:[%s2248_s9 + $0x2b8] sm:$0xff] }
  0xb6   : > { %1624 = vmatpush3.msra.mxu1 %v563_v10  ;;  %1364 = vmatprep.mubr.msk.f32.mxu0 %vm412_vm0, %v462_v58  ;;  %v501_v58 = vsel %vm492_vm2, %v498_v44, %v500_v53  ;;  %v1393_v10 = vld [vmem:[%s2248_s9 + $0x220] sm:$0xff] }
  0xb7   : > { %1465 = vmatpush3.msra.mxu0 %v530_v16  ;;  %1625 = vmatprep.subr.mxu1 %v562_v18  ;;  %v2458_v16 = vrot.slane %v2005_v28, 7 }
  0xb8   : > { %1366 = vmatmul.mubr.msk.f32.vlgmr.msra.gmra.mxu0 %vm2384_vm4, %v493_v17  ;;  %1626 = vmatpush3.msra.mxu1 %v562_v18  ;;  %v1391_v17 = vld [vmem:[%s2248_s9 + $0x210] sm:$0xff] }
  0xb9   : > { %1627 = vmatprep.mubr.f32.mxu1 %v514_v23  ;;  %647 = vmatprep.mubr.f32.mxu0 %v2355_v1  ;;  %v1396_v1 = vld [vmem:[%s2248_s9 + $0x238] sm:$0xff]  ;;  %v1411_v18 = vld [vmem:[%s2248_s9 + $0x2b0] sm:$0xff]  ;;  %v503_v19 = vsel %vm492_vm2, %v500_v53, %v2458_v16  ;;  %v1390_v23 = vld [vmem:[%s2248_s9 + $0x208] sm:$0xff] }
  0xba   : > { %1628 = vmatmul.mubr.f32.vlgmr.msra.gmra.mxu1 %v516_v24  ;;  %1506 = vmatprep.subr.mxu0 %v1404_v26  ;;  %v1410_v24 = vld [vmem:[%s2248_s9 + $0x2a8] sm:$0xff]  ;;  %v1389_v26 = vld [vmem:[%s2248_s9 + $0x200] sm:$0xff] }
  0xbb   : > { %1630 = vmatprep.mubr.f32.mxu1 %v518_v27  ;;  %1507 = vmatpush3.msra.mxu0 %v1388_v30  ;;  %v1409_v27 = vld [vmem:[%s2248_s9 + $0x2a0] sm:$0xff]  ;;  %v1408_v30 = vld [vmem:[%s2248_s9 + $0x298] sm:$0xff] }
  0xbc   : > { %648 = vmatmul.mubr.f32.gmra.mxu0 %v495_v31  ;;  %1508 = vmatprep.subr.mxu0 %v1403_v33  ;;  %v1407_v31 = vld [vmem:[%s2248_s9 + $0x290] sm:$0xff]  ;;  %v1405_v33 = vld [vmem:[%s2248_s9 + $0x280] sm:$0xff] }
  0xbd   : > { %652 = vmatprep.mubr.f32.mxu0 %v2361_v5  ;;  %1509 = vmatpush3.msra.mxu0 %v1387_v34  ;;  %v1415_v5 = vld [vmem:[%s2248_s9 + $0x2d0] sm:$0xff] }
  0xbe   : > { %1631 = vmatmul.mubr.f32.gmra.mxu1 %v520_v36  ;;  %1510 = vmatprep.subr.mxu0 %v1402_v37 }
  0xbf   : > { %1633 = vmatprep.mubr.f32.mxu1 %v522_v38  ;;  %1511 = vmatpush3.msra.mxu0 %v1386_v39 }
  0xc0   : > { %653 = vmatmul.mubr.f32.gmra.mxu0 %v497_v41  ;;  %1512 = vmatprep.subr.mxu0 %v1401_v45  ;;  %v1370_v41 = vld [vmem:[%s2255_s14 + $0x1] ss:$0 sm:$0xff] }
  0xc1   : > { %657 = vmatprep.mubr.f32.mxu0 %v2364_v7  ;;  %1513 = vmatpush3.msra.mxu0 %v1385_v46  ;;  %v1394_v7 = vld [vmem:[%s2248_s9 + $0x228] sm:$0xff]  ;;  %v1372_v46 = vld [vmem:[%s2261_s15 + $0x1] ss:$0 sm:$0xff] }
  0xc2   : > { %1634 = vmatmul.mubr.msk.f32.gmra.mxu1 %vm511_vm3, %v2399_v29  ;;  %1514 = vmatprep.subr.mxu0 %v1400_v49 }
  0xc3   : > { %1636 = vmatprep.subr.mxu1 %v1420_v50  ;;  %1515 = vmatpush3.msra.mxu0 %v1384_v51 }
  0xc4   : > { %658 = vmatmul.mubr.f32.gmra.mxu0 %v499_v52  ;;  %1637 = vmatpush3.msra.mxu1 %v1420_v50 }
  0xc5   : > { %1367 = vmatprep.mubr.msk.f32.mxu0 %vm422_vm1, %v466_v8  ;;  %1516 = vmatprep.subr.mxu0 %v1399_v54  ;;  %v1414_v8 = vld [vmem:[%s2248_s9 + $0x2c8] sm:$0xff] }
  0xc6   : > { %1638 = vmatprep.subr.mxu1 %v1419_v55  ;;  %1517 = vmatpush3.msra.mxu0 %v1383_v56 }
  0xc7   : > { %1639 = vmatpush3.msra.mxu1 %v1419_v55  ;;  %1518 = vmatprep.subr.mxu0 %v1398_v57 }
  0xc8   : > { %663 = vmatmul.mubr.f32.gmra.mxu0 %v501_v58  ;;  %1640 = vmatprep.subr.mxu1 %v1418_v59 }
  0xc9   : > { %1519 = vmatpush3.msra.mxu0 %v1382_v61  ;;  %1641 = vmatpush3.msra.mxu1 %v1418_v59 }
  0xca   : > { %1520 = vmatprep.subr.mxu0 %v1397_v62  ;;  %1642 = vmatprep.subr.mxu1 %v1417_v0 }
  0xcb   : > { %1521 = vmatpush3.msra.mxu0 %v1381_v60  ;;  %1643 = vmatpush3.msra.mxu1 %v1417_v0 }
  0xcc   : > { %667 = vmatprep.mubr.f32.mxu0 %v2005_v28  ;;  %1522 = vmatprep.subr.mxu0 %v1396_v1 }
  0xcd   : > { %1644 = vmatprep.subr.mxu1 %v1416_v2  ;;  %1523 = vmatpush3.msra.mxu0 %v1380_v3 }
  0xce   : > { %1645 = vmatpush3.msra.mxu1 %v1416_v2  ;;  %1524 = vmatprep.subr.mxu0 %v1395_v4 }
  0xcf   : > { %1646 = vmatprep.subr.mxu1 %v1415_v5  ;;  %1525 = vmatpush3.msra.mxu0 %v1379_v6 }
  0xd0   : > { %1647 = vmatpush3.msra.mxu1 %v1415_v5  ;;  %1526 = vmatprep.subr.mxu0 %v1394_v7 }
  0xd1   : > { %1648 = vmatprep.subr.mxu1 %v1414_v8  ;;  %1527 = vmatpush3.msra.mxu0 %v1378_v9 }
  0xd2   : > { %1649 = vmatpush3.msra.mxu1 %v1414_v8  ;;  %1528 = vmatprep.subr.mxu0 %v1393_v10 }
  0xd3   : > { %1650 = vmatprep.subr.mxu1 %v1413_v11  ;;  %1529 = vmatpush3.msra.mxu0 %v1377_v12 }
  0xd4   : > { %1651 = vmatpush3.msra.mxu1 %v1413_v11  ;;  %1530 = vmatprep.subr.mxu0 %v1392_v13 }
  0xd5   : > { %1652 = vmatprep.subr.mxu1 %v1412_v14  ;;  %1531 = vmatpush3.msra.mxu0 %v1376_v15 }
  0xd6   : > { %1653 = vmatpush3.msra.mxu1 %v1412_v14  ;;  %1532 = vmatprep.subr.mxu0 %v1391_v17 }
  0xd7   : > { %1654 = vmatprep.subr.mxu1 %v1411_v18  ;;  %668 = vmatmul.mubr.f32.gmra.mxu0 %v503_v19 }
  0xd8   : > { %1655 = vmatpush3.msra.mxu1 %v1411_v18  ;;  %1533 = vmatpush3.msra.mxu0 %v1375_v22 }
  0xd9   : > { %1656 = vmatprep.subr.mxu1 %v1410_v24  ;;  %1534 = vmatprep.subr.mxu0 %v1390_v23 }
  0xda   : > { %1657 = vmatpush3.msra.mxu1 %v1410_v24  ;;  %1535 = vmatpush3.msra.mxu0 %v1374_v25 }
  0xdb   : > { %1658 = vmatprep.subr.mxu1 %v1409_v27  ;;  %1536 = vmatprep.subr.mxu0 %v1389_v26 }
  0xdc   : > { %1659 = vmatpush3.msra.mxu1 %v1409_v27  ;;  %1537 = vmatpush3.msra.mxu0 %v1373_v20 }
  0xdd   : > { %1660 = vmatprep.subr.mxu1 %v1408_v30 }
  0xde   : > { %1661 = vmatpush3.msra.mxu1 %v1408_v30 }
  0xdf   : > { %1662 = vmatprep.subr.mxu1 %v1407_v31 }
  0xe0   : > { %1663 = vmatpush3.msra.mxu1 %v1407_v31 }
  0xe1   : > { %1664 = vmatprep.subr.mxu1 %v1406_v32 }
  0xe2   : > { %1665 = vmatpush3.msra.mxu1 %v1406_v32 }
  0xe3   : > { %1666 = vmatprep.subr.mxu1 %v1405_v33 }
  0xe4   : > { %1667 = vmatpush3.msra.mxu1 %v1405_v33 }
 0x178   : > { %v1466_v34 = vpop.f32.mrf.mxu0 }
 0x17a   : > { %v1629_v36 = vpop.f32.mrf.mxu1  ;;  %v1467_v37 = vpop.f32.mrf.mxu0 }
 0x17b   : > { %v1468_v38 = vadd.f32 %v1467_v37, %v1466_v34 }
 0x17c   : > { %v739_v39 = vpop.f32.mrf.mxu1  ;;  %v1469_v44 = vpop.f32.mrf.mxu0 }
 0x17d   : > { %v740_v45 = vadd.f32 %v1468_v38, %v739_v39 }
 0x17e   : > { %v1470_v49 = vpop.f32.mrf.mxu0  ;;  %v1632_v50 = vpop.f32.mrf.mxu1 }
 0x17f   : > { %v776_v51 = vmul.f32 %v1370_v41, %v740_v45  ;;  %v1471_v52 = vadd.f32 %v1470_v49, %v1469_v44 }
 0x180   : > { %v1472_v53 = vpop.f32.mrf.mxu0  ;;  %v749_v54 = vpop.f32.mrf.mxu1 }
 0x181   : > { %v790_v55 = vadd.f32 %v1372_v46, %v776_v51  ;;  %v745_v56 = vadd.f32 %v1629_v36, %v1471_v52 }
 0x182   : > { %v1473_v57 = vpop.f32.mrf.mxu0  ;;  %v1635_v58 = vpop.f32.mrf.mxu1 }
 0x183   : > { %v796_v59 = vmax.f32 %v790_v55, 0.0  ;;  %v777_v61 = vmul.f32 %v1370_v41, %v745_v56  ;;  %v1474_v62 = vadd.f32 %v1473_v57, %v1472_v53 }
 0x184   : > { %v1475_v0 = vpop.f32.mrf.mxu0  ;;  %v759_v22 = vpop.f32.mrf.mxu1 }
 0x185   : > { %v802_v60 = vsel %vm412_vm0, %v796_v59, 0.0  ;;  %v750_v1 = vadd.f32 %v1474_v62, %v749_v54  ;;  %1421 = vmatprep.mubr.msk.f32.mxu0 %vm412_vm0, %v796_v59  ;;  %v791_v2 = vadd.f32 %v1372_v46, %v777_v61 }
 0x186   : > { %v814_v3 = vrot.slane %v802_v60, 7  ;;  %v1476_v4 = vpop.f32.mrf.mxu0  ;;  %v832_v9 = vrot.slane %v802_v60, 1 }
 0x187   : > { %v778_v5 = vmul.f32 %v1370_v41, %v750_v1  ;;  %v1477_v6 = vadd.f32 %v1476_v4, %v1475_v0  ;;  %v797_v7 = vmax.f32 %v791_v2, 0.0 }
 0x188   : > { %v1478_v8 = vpop.f32.mrf.mxu0  ;;  %1423 = vmatmul.mubr.msk.f32.vlgmr.msra.gmra.mxu0 %vm2384_vm4, %v814_v3 }
 0x189   : > { %v755_v10 = vadd.f32 %v1632_v50, %v1477_v6  ;;  %968 = vmatprep.mubr.f32.mxu0 %v797_v7  ;;  %v815_v11 = vrot.slane %v797_v7, 7  ;;  %v833_v12 = vrot.slane %v797_v7, 1  ;;  %v792_v13 = vadd.f32 %v1372_v46, %v778_v5 }
 0x18a   : > { %v1479_v14 = vpop.f32.mrf.mxu0 }
 0x18b   : > { %v779_v15 = vmul.f32 %v1370_v41, %v755_v10  ;;  %v1480_v17 = vadd.f32 %v1479_v14, %v1478_v8  ;;  %v816_v18 = vsel %vm492_vm2, %v814_v3, %v815_v11  ;;  %v834_v19 = vsel %vm511_vm3, %v832_v9, %v833_v12 }
 0x18c   : > { %969 = vmatmul.mubr.f32.gmra.mxu0 %v816_v18  ;;  %1668 = vmatprep.mubr.f32.mxu1 %v834_v19  ;;  %v798_v23 = vmax.f32 %v792_v13, 0.0 }
 0x18d   : > { %v760_v24 = vadd.f32 %v1480_v17, %v759_v22  ;;  %v793_v21 = vadd.f32 %v1372_v46, %v779_v15 }
 0x18e   : > { %v835_v25 = vrot.slane %v798_v23, 1  ;;  %973 = vmatprep.mubr.f32.mxu0 %v798_v23  ;;  %v817_v26 = vrot.slane %v798_v23, 7 }
 0x18f   : > { %v780_v27 = vmul.f32 %v1370_v41, %v760_v24  ;;  %v799_v20 = vmax.f32 %v793_v21, 0.0 }
 0x190   : > { %v818_v30 = vsel %vm492_vm2, %v815_v11, %v817_v26  ;;  %v836_v31 = vsel %vm511_vm3, %v833_v12, %v835_v25 }
 0x191   : > { %v794_v32 = vadd.f32 %v1372_v46, %v780_v27  ;;  %974 = vmatmul.mubr.f32.gmra.mxu0 %v818_v30  ;;  %1669 = vmatmul.mubr.f32.vlgmr.msra.gmra.mxu1 %v836_v31  ;;  %v819_v33 = vrot.slane %v799_v20, 7  ;;  %v837_v34 = vrot.slane %v799_v20, 1 }
 0x192   : > { %978 = vmatprep.mubr.f32.mxu0 %v799_v20 }
 0x193   : > { %v800_v36 = vmax.f32 %v794_v32, 0.0  ;;  %v820_v37 = vsel %vm492_vm2, %v817_v26, %v819_v33  ;;  %v838_v38 = vsel %vm511_vm3, %v835_v25, %v837_v34 }
 0x194   : > { %1671 = vmatprep.mubr.f32.mxu1 %v838_v38 }
 0x195   : > { %v806_v39 = vsel %vm422_vm1, %v800_v36, 0.0  ;;  %979 = vmatmul.mubr.f32.gmra.mxu0 %v820_v37 }
 0x196   : > { %1424 = vmatprep.mubr.msk.f32.mxu0 %vm422_vm1, %v800_v36  ;;  %v821_v41 = vrot.slane %v806_v39, 7  ;;  %v839_v44 = vrot.slane %v806_v39, 1 }
 0x197   : > { %v1481_v51 = vpop.f32.mrf.mxu0 }
 0x198   : > { %v822_v45 = vsel %vm492_vm2, %v819_v33, %v821_v41  ;;  %v840_v46 = vsel %vm511_vm3, %v837_v34, %v839_v44  ;;  %v842_v49 = vsel %vm511_vm3, %v839_v44, %v2399_v29  ;;  %v824_v50 = vsel %vm492_vm2, %v821_v41, %v2458_v16 }
 0x199   : > { %984 = vmatmul.mubr.f32.gmra.mxu0 %v822_v45  ;;  %1672 = vmatmul.mubr.f32.gmra.mxu1 %v840_v46  ;;  %v1482_v52 = vpop.f32.mrf.mxu0 }
 0x19a   : > { %1674 = vmatprep.mubr.f32.mxu1 %v842_v49  ;;  %988 = vmatprep.mubr.f32.mxu0 %v2005_v28 }
 0x19d   : > { %989 = vmatmul.mubr.f32.gmra.mxu0 %v824_v50  ;;  %1675 = vmatmul.mubr.msk.f32.gmra.mxu1 %vm511_vm3, %v2399_v29 }
 0x248   : > { %v1538_v53 = vpop.f32.mrf.mxu0 }
 0x24a   : > { %v1539_v54 = vpop.f32.mrf.mxu0 }
 0x24b   : > { %v1540_v56 = vadd.f32 %v1539_v54, %v1538_v53 }
 0x24c   : > { %v1541_v55 = vpop.f32.mrf.mxu0 }
 0x24d   : > { %v966_v28 = vadd.f32 %v1540_v56, %v2317_v35 }
 0x24e   : > { %v1542_v57 = vpop.f32.mrf.mxu0 }
 0x24f   : > { %v1543_v58 = vadd.f32 %v1542_v57, %v1541_v55 }
 0x251   : > { %v1544_v59 = vpop.f32.mrf.mxu0  ;;  %v971_v61 = vadd.f32 %v1543_v58, %v2326_v42  ;;  %v1670_v62 = vpop.f32.mrf.mxu1 }
 0x253   : > { %v1066_v0 = vadd.f32 %v1670_v62, %v971_v61  ;;  %v1545_v16 = vpop.f32.mrf.mxu0  ;;  %v1060_v60 = vpop.f32.mrf.mxu1 }
 0x254   : > { %v1061_v1 = vadd.f32 %v1060_v60, %v966_v28  ;;  %v1546_v2 = vadd.f32 %v1545_v16, %v1544_v59 }
 0x255   : > { %1096 = vst [vmem:[#allocation2 + $0x10] sm:$0xff] %v1066_v0  ;;  %v1547_v29 = vpop.f32.mrf.mxu0 }
 0x256   : > { %v1089_v3 = vsel %vm412_vm0, %v1061_v1, 0.0  ;;  %v976_v8 = vadd.f32 %v1546_v2, %v2328_v43 }
 0x257   : > { %1095 = vst [vmem:[#allocation2 + $0x28] sm:$0xff] %v1089_v3  ;;  %v1548_v4 = vpop.f32.mrf.mxu0 }
 0x258   : > { %v1549_v5 = vadd.f32 %v1548_v4, %v1547_v29 }
 0x259   : > { %v1550_v6 = vpop.f32.mrf.mxu0  ;;  %v1673_v7 = vpop.f32.mrf.mxu1 }
 0x25a   : > { %v981_v42 = vadd.f32 %v1549_v5, %v2333_v47 }
 0x25b   : > { %v1551_v35 = vpop.f32.mrf.mxu0  ;;  %v1070_v9 = vpop.f32.mrf.mxu1 }
 0x25c   : > { %v1076_v10 = vadd.f32 %v1673_v7, %v981_v42  ;;  %v1552_v11 = vadd.f32 %v1551_v35, %v1550_v6  ;;  %v1071_v12 = vadd.f32 %v1070_v9, %v976_v8 }
 0x25d   : > { %v1553_v13 = vpop.f32.mrf.mxu0  ;;  %v1676_v14 = vpop.f32.mrf.mxu1 }
 0x25e   : > { %1098 = vst [vmem:[#allocation2] sm:$0xff] %v1076_v10  ;;  %1097 = vst [vmem:[#allocation2 + $0x8] sm:$0xff] %v1071_v12  ;;  %v986_v40 = vadd.f32 %v1552_v11, %v2335_v48 }
 0x25f   : > { %v1554_v15 = vpop.f32.mrf.mxu0  ;;  %v1080_v17 = vpop.f32.mrf.mxu1  ;;  %1104 = sbr.rel (%p1426_p9) target bundleno = 841 (0x349), region = 76 }
 0x260   : > { %v1081_v18 = vadd.f32 %v1080_v17, %v986_v40 }
 0x262   : > { %v1093_v19 = vsel %vm422_vm1, %v1081_v18, 0.0 }
 0x263   : > { %1099 = vst [vmem:[#allocation2 + $0x18] sm:$0xff] %v1093_v19 }
 0x264   : > { %v1147_v43 = vld [vmem:[%s2644_s16 + $0x78] sm:$0xff]  ;;  %v2006_v47 = vmov 0.0   ;;  %v1146_v48 = vld [vmem:[%s2644_s16 + $0x70] sm:$0xff]  ;;  %vm2007_vm5 = vmmov 0   ;;  %v1145_v63 = vld [vmem:[%s2644_s16 + $0x68] sm:$0xff]  ;;  %v1129_v28 = vstv %s1128_s5  ;;  %vm1220_vm6 = vcmask 8192  }
 0x265   : > { %1677 = vmatprep.subr.mxu0 %v2006_v47  ;;  %1709 = vmatprep.mubr.msk.f32.mxu0 %vm2007_vm5, %v2006_v47  ;;  %v1144_v22 = vld [vmem:[%s2644_s16 + $0x60] sm:$0xff]  ;;  %v1105_v23 = vld [vmem:[#allocation10] sm:$0xff]  ;;  %v1107_v21 = vld [vmem:[#allocation10 + $0x10] sm:$0xff]  ;;  %v1149_v29 = vstv %s1427_s19 }
 0x266   : > { %1678 = vmatpush3.msra.mxu0 %v1147_v43  ;;  %v1106_v24 = vld [vmem:[#allocation10 + $0x8] sm:$0xff]  ;;  %v1108_v25 = vld [vmem:[#allocation10 + $0x18] sm:$0xff]  ;;  %v1111_v26 = vmul.f32 %v1105_v23, %v1089_v3  ;;  %v1143_v20 = vld [vmem:[%s2644_s16 + $0x58] sm:$0xff]  ;;  %v1113_v31 = vmul.f32 %v1107_v21, %v1071_v12 }
 0x267   : > { %1679 = vmatprep.subr.mxu0 %v2006_v47  ;;  %v1112_v27 = vmul.f32 %v1106_v24, %v1066_v0  ;;  %v1109_v30 = vld [vmem:[#allocation10 + $0x20] sm:$0xff]  ;;  %v1114_v32 = vmul.f32 %v1108_v25, %v1076_v10  ;;  %v1142_v34 = vld [vmem:[%s2644_s16 + $0x50] sm:$0xff]  ;;  %v1110_v36 = vld [vmem:[#allocation10 + $0x28] sm:$0xff] }
 0x268   : > { %1680 = vmatpush3.msra.mxu0 %v1146_v48  ;;  %v1115_v37 = vmul.f32 %v1109_v30, %v1093_v19  ;;  %v1141_v39 = vld [vmem:[%s2644_s16 + $0x48] sm:$0xff]  ;;  %v1116_v41 = vmul.f32 0.0, %v1110_v36  ;;  %v1140_v45 = vld [vmem:[%s2644_s16 + $0x40] sm:$0xff]  ;;  %v1139_v49 = vld [vmem:[%s2644_s16 + $0x38] sm:$0xff] }
 0x269   : > { %1681 = vmatprep.subr.mxu0 %v2006_v47  ;;  %v1117_v33 = vadd.f32 %v1112_v27, %v1111_v26  ;;  %v1138_v51 = vld [vmem:[%s2644_s16 + $0x30] sm:$0xff]  ;;  %v1137_v53 = vld [vmem:[%s2644_s16 + $0x28] sm:$0xff]  ;;  %v1136_v55 = vld [vmem:[%s2644_s16 + $0x20] sm:$0xff] }
 0x26a   : > { %1682 = vmatpush3.msra.mxu0 %v1145_v63  ;;  %v1135_v57 = vld [vmem:[%s2644_s16 + $0x18] sm:$0xff]  ;;  %v1134_v59 = vld [vmem:[%s2644_s16 + $0x10] sm:$0xff]  ;;  %v1133_v62 = vld [vmem:[%s2644_s16 + $0x8] sm:$0xff] }
 0x26b   : > { %1683 = vmatprep.subr.mxu0 %v2006_v47  ;;  %v1118_v38 = vadd.f32 %v1117_v33, %v1113_v31  ;;  %v1132_v16 = vld [vmem:[%s2644_s16] sm:$0xff] }
 0x26c   : > { %1684 = vmatpush3.msra.mxu0 %v1144_v22 }
 0x26d   : > { %1685 = vmatprep.subr.mxu0 %v2006_v47  ;;  %v1119_v44 = vadd.f32 %v1118_v38, %v1114_v32 }
 0x26e   : > { %1686 = vmatpush3.msra.mxu0 %v1143_v20 }
 0x26f   : > { %1687 = vmatprep.subr.mxu0 %v2006_v47  ;;  %v1120_v46 = vadd.f32 %v1119_v44, %v1115_v37 }
 0x270   : > { %1688 = vmatpush3.msra.mxu0 %v1142_v34 }
 0x271   : > { %1689 = vmatprep.subr.mxu0 %v2006_v47  ;;  %v1121_v50 = vadd.f32 %v1120_v46, %v1116_v41 }
 0x272   : > { %1690 = vmatpush3.msra.mxu0 %v1141_v39 }
 0x273   : > { %1691 = vmatprep.subr.mxu0 %v2006_v47  ;;  %v1122_v52 = vrot.slane %v1121_v50, 4 }
 0x274   : > { %1692 = vmatpush3.msra.mxu0 %v1140_v45 }
 0x275   : > { %1693 = vmatprep.subr.mxu0 %v2006_v47  ;;  %v1123_v54 = vadd.f32 %v1122_v52, %v1121_v50 }
 0x276   : > { %1694 = vmatpush3.msra.mxu0 %v1139_v49 }
 0x277   : > { %1695 = vmatprep.subr.mxu0 %v2006_v47  ;;  %v1124_v56 = vrot.slane %v1123_v54, 2 }
 0x278   : > { %1696 = vmatpush3.msra.mxu0 %v1138_v51 }
 0x279   : > { %1697 = vmatprep.subr.mxu0 %v2006_v47  ;;  %v1125_v58 = vadd.f32 %v1124_v56, %v1123_v54 }
 0x27a   : > { %1698 = vmatpush3.msra.mxu0 %v1137_v53 }
 0x27b   : > { %1699 = vmatprep.subr.mxu0 %v2006_v47  ;;  %v1126_v61 = vrot.slane %v1125_v58, 1 }
 0x27c   : > { %1700 = vmatpush3.msra.mxu0 %v1136_v55 }
 0x27d   : > { %1701 = vmatprep.subr.mxu0 %v2006_v47  ;;  %v1127_v0 = vadd.f32 %v1126_v61, %v1125_v58 }
 0x27e   : > { %1702 = vmatpush3.msra.mxu0 %v1135_v57 }
 0x27f   : > { %1703 = vmatprep.subr.mxu0 %v2006_v47  ;;  %v1130_v60 = vadd.f32 %v1129_v28, %v1127_v0 }
 0x280   : > { %1704 = vmatpush3.msra.mxu0 %v1134_v59 }
 0x281   : > { %1705 = vmatprep.subr.mxu0 %v2006_v47  ;;  %v1131_v1 = vmax.f32 %v1130_v60, 0.0 }
 0x282   : > { %1706 = vmatpush3.msra.mxu0 %v1133_v62 }
 0x283   : > { %1707 = vmatprep.subr.mxu0 %v2006_v47 }
 0x284   : > { %1708 = vmatpush3.msra.mxu0 %v1132_v16 }
 0x285   : > { %1710 = vmatmul.mubr.f32.vlgmr.msra.gmra.mxu0 %v1131_v1 }
 0x345   : > { %v1216_v2 = vpop.f32.mrf.mxu0 }
 0x346   : > { %v1217_v3 = vadd.f32 %v1216_v2, %v1149_v29 }
 0x347   : > { %v1711_v4 = vpop.f32.mrf.mxu0 }
 0x348   : > { %1221 = vst.msk [vmem:[#allocation13] sm:$0x1] %vm1220_vm6, %v1217_v3 }
 0x349 PF: > { %p1755_p11 = scmp.eq.s32.totalorder %s2145_s17, 5  ;;  %s2008_s14 = smov [#allocation13]  }
 0x34a   : > { %s1229_s15 = sshll.u32 %s2008_s14, 4  ;;  %s1230_s15 = int_to_ptr.vmem [resolvable:$true] %s1229_s15 }
 0x34b   : > { %s1920_s13 = scalar_lea.vmem %s1230_s15, 16  ;;  %s1926_s11 = scalar_lea.vmem %s1230_s15, 32 }
 0x34c   : > { %p1921_p12 = scmp.ne.s32.totalorder %s1230_s15, %s1920_s13  ;;  %p1927_p2 = scmp.lt.s32.totalorder %s1230_s15, %s1230_s15 }
 0x34d   : > { %p1928_p3 = scmp.lt.s32.totalorder %s1926_s11, %s1920_s13 }
 0x34e   : > { %p1922_p13 = pnand %p1921_p12, %p1755_p11 }
 0x34f   : > { %p1929_p7 = por %p1928_p3, %p1927_p2 }
 0x350   : > { %p1923_p0 = pneg %p1922_p13 }
 0x352   : > { %p1930_p4 = pnand %p1929_p7, %p1923_p0 }
 0x354   : > { %1933 = shalt.err (!%p1930_p4)
}
 0x355   : > { %s2645_s30 = sld [smem:[#allocation24_spill]] }
 0x35b   : > { %1730 = dma.vmem_to_hbm [thread:$0]  (%p1755_p11), %s1230_s15, 16, %s2645_s30, [#allocation5]  }
 0x35c   : > { %1977 = dma.done.wait (%p1755_p11), [#allocation5], 16  }
 0x35d   : > { %1979 = vsyncadd (%p1755_p11), [#allocation5], 4294967280 }
 0x35e PF: > { %s2646_s27 = sld [smem:[#allocation20_spill]]  ;;  %s2649_s24 = smov %s1986_s25 }
 0x35f   : > { %s2647_s18 = sld [smem:[#allocation19_spill]] }
 0x360   : > { %s2648_s26 = sld [smem:[#allocation21_spill]] }
 0x364   : > { %p23_p5 = scmp.ge.s32.totalorder %s2646_s27, 8  }
 0x365   : > { %s2650_s25 = smov %s2647_s18 }
 0x366   :  { %25 = sbr.rel (!%p23_p5) target bundleno = 12 (0xc), region = 129 }
 0x36b   :  { %1242 = vsyncpa [#allocation4], 1 }
 0x36c   :  { %1244 = vsyncpa [#allocation4 + $0x1], 1 }
 0x36d   :  { %1245 = vsyncpa [#allocation8], 1 }
 0x36e   :  { %1247 = vsyncpa [#allocation8 + $0x1], 1 }
 0x36f   :  { %1248 = vsyncpa [#allocation11], 1 }
 0x370   :  { %1249 = vsyncpa [#allocation5], 1 }
 0x371   :  { %1251 = vsyncpa [#allocation5 + $0x1], 1 }
 0x372   :  { %1252 = vsyncpa [#allocation6], 1 }
 0x373   :  { %1254 = vsyncpa [#allocation6 + $0x1], 1 }

</bundles_post_ra>
